<compile_context>
chip_gen: v7x
topology: tpu7x:2x2x1
jax: 0.10.0
libtpu: 0.0.40
codegen_flags: <defaults>
</compile_context>

<pallas_src>
import math

import jax
import jax.numpy as jnp
from jax.experimental import pallas as pl
from jax.experimental.pallas import tpu as pltpu


# ---------------------------------------------------------------------------
# Tiling helpers
# ---------------------------------------------------------------------------

def _round_up(x, m):
    return ((x + m - 1) // m) * m


def _plan_dim(dim, target=512, max_tile=1024, ensure_two=False):
    """Pick (tile, padded_dim): tile is a multiple of 128 dividing padded_dim.

    Prefers tiles near `target`; avoids the 128-wide fallback by taking the
    whole (128-padded) dim as a single block when it is <= max_tile, which also
    avoids wasting HBM bytes on extra zero padding.  With ensure_two, a
    single-tile axis is split in two (megacore sharding on v7x) when the halves
    stay 128-aligned.
    """
    p = _round_up(dim, 128)
    divs = [d for d in range(128, min(p, max_tile) + 1, 128) if p % d == 0]
    below = [d for d in divs if d <= target]
    above = [d for d in divs if d > target]
    if below and below[-1] >= 256:
        tile = below[-1]              # largest friendly divisor <= target
    elif p <= max_tile:
        tile = p                      # whole dim as one block (e.g. 640, 896)
    elif above:
        tile = above[0]               # smallest divisor in (target, max_tile]
    else:
        tile = below[-1]              # rare 128-wide fallback
    padded = p
    if (ensure_two and padded // tile == 1 and padded >= 256
            and (padded // 2) % 128 == 0):
        tile = padded // 2            # >=2 grid steps on the parallel N axis
    return tile, padded


# ---------------------------------------------------------------------------
# Kernel
# ---------------------------------------------------------------------------

def _make_kernel(noisy, x_resident, tk):
    """Build the (N, K)-grid kernel. Output block (0, j) is constant across K,
    so it stays VMEM-resident and is used directly as the f32 accumulator."""

    def body(x_ref, w_refs, b_ref, o_ref):
        k = pl.program_id(1)

        @pl.when(k == 0)
        def _():
            o_ref[...] = jnp.zeros_like(o_ref)

        if x_resident:
            start = pl.multiple_of(k * tk, tk)
            x_blk = x_ref[:, pl.ds(start, tk)]
        else:
            x_blk = x_ref[...]

        if noisy:
            # VPU noise mix on the (tk, tn) weight tile; weights are stored
            # pre-transposed so the MXU consumes the tile directly.
            w = w_refs[0][...] + w_refs[1][...] * w_refs[2][...]
        else:
            w = w_refs[0][...]

        o_ref[...] += jnp.dot(x_blk, w, preferred_element_type=jnp.float32)

        @pl.when(k == pl.num_programs(1) - 1)
        def _():
            o_ref[...] += b_ref[...]          # (1, tn) f32, broadcast over rows

    if noisy:
        def kernel(x_ref, wmu_ref, wsig_ref, weps_ref, b_ref, o_ref):
            body(x_ref, (wmu_ref, wsig_ref, weps_ref), b_ref, o_ref)
    else:
        def kernel(x_ref, wmu_ref, b_ref, o_ref):
            body(x_ref, (wmu_ref,), b_ref, o_ref)
    return kernel


# ---------------------------------------------------------------------------
# One-time parameter preparation (pad / cast / transpose ONCE, not per call)
# ---------------------------------------------------------------------------

def prepare_noisy_linear(params, mode="Train", compute_dtype=jnp.float32):
    """Pre-pad, pre-cast and pre-transpose the NoisyLinear parameters.

    Weights are stored as (in_pad, out_pad) so the kernel's jnp.dot needs no
    transpose.  The effective bias is folded to a single f32 stream.
    Call this once and reuse the result across forward calls.
    """
    out_dim, in_dim = params["weight_mu"].shape
    cdt = jnp.dtype(compute_dtype)
    tk, in_pad = _plan_dim(in_dim, target=512)
    tn, out_pad = _plan_dim(out_dim, target=512, ensure_two=True)

    def prep_w(w):
        wt = jnp.asarray(w).T                      # (in, out)
        if wt.shape != (in_pad, out_pad):
            wt = jnp.pad(wt, ((0, in_pad - in_dim), (0, out_pad - out_dim)))
        return wt.astype(cdt)

    noisy = (mode == "Train")
    if noisy:
        weights = (prep_w(params["weight_mu"]),
                   prep_w(params["weight_sigma"]),
                   prep_w(params["weight_epsilon"]))
        b_eff = params["bias_mu"] + params["bias_sigma"] * params["bias_epsilon"]
    else:
        weights = (prep_w(params["weight_mu"]),)
        b_eff = params["bias_mu"]
    b_eff = jnp.pad(jnp.asarray(b_eff, jnp.float32),
                    (0, out_pad - out_dim)).reshape(1, out_pad)

    return {
        "weights": weights, "bias": b_eff, "noisy": noisy,
        "in_dim": in_dim, "out_dim": out_dim,
        "in_pad": in_pad, "out_pad": out_pad, "tk": tk, "tn": tn,
        "compute_dtype": cdt,
    }


# ---------------------------------------------------------------------------
# Forward
# ---------------------------------------------------------------------------

_X_RESIDENT_BYTES = 8 * 1024 * 1024   # keep x fully in VMEM below this size


def noisy_linear_forward(x, prepared):
    """Pallas forward of NoisyLinear using parameters from prepare_noisy_linear."""
    B, in_dim = x.shape
    assert in_dim == prepared["in_dim"], "input feature dim mismatch"

    cdt = prepared["compute_dtype"]
    ebytes = cdt.itemsize
    in_pad, out_pad = prepared["in_pad"], prepared["out_pad"]
    tk, tn = prepared["tk"], prepared["tn"]

    # Sublane-aligned batch (full packed sublanes for 16-bit dtypes).
    B_pad = _round_up(B, 8 * 4 // ebytes)
    if x.shape != (B_pad, in_pad) or x.dtype != cdt:
        x_p = jnp.pad(x, ((0, B_pad - B), (0, in_pad - in_dim))).astype(cdt)
    else:
        x_p = x

    x_resident = B_pad * in_pad * ebytes <= _X_RESIDENT_BYTES
    grid = (out_pad // tn, in_pad // tk)          # (parallel N, reduction K)

    if x_resident:
        x_spec = pl.BlockSpec((B_pad, in_pad), lambda j, k: (0, 0))
    else:
        x_spec = pl.BlockSpec((B_pad, tk), lambda j, k: (0, k))
    w_spec = pl.BlockSpec((tk, tn), lambda j, k: (k, j))
    b_spec = pl.BlockSpec((1, tn), lambda j, k: (0, j))
    o_spec = pl.BlockSpec((B_pad, tn), lambda j, k: (0, j))

    n_w = len(prepared["weights"])
    in_specs = [x_spec] + [w_spec] * n_w + [b_spec]
    inputs = (x_p,) + prepared["weights"] + (prepared["bias"],)
    kernel = _make_kernel(prepared["noisy"], x_resident, tk)

    # VMEM budget: double-buffered weight tiles + x + output block + bias.
    vmem_needed = (n_w * 2 * tk * tn * ebytes
                   + (B_pad * in_pad * ebytes if x_resident
                      else 2 * B_pad * tk * ebytes)
                   + 2 * B_pad * tn * 4
                   + 2 * tn * 4)
    vmem_limit = max(32 * 1024 * 1024, int(vmem_needed * 5 // 4))

    x_reads = 1 if x_resident else grid[0]
    cost = pl.CostEstimate(
        flops=2 * B_pad * in_pad * out_pad
              + (2 * in_pad * out_pad if prepared["noisy"] else 0),
        transcendentals=0,
        bytes_accessed=(ebytes * (n_w * in_pad * out_pad
                                  + x_reads * B_pad * in_pad)
                        + 4 * (out_pad + B_pad * out_pad)),
    )

    y_pad = pl.pallas_call(
        kernel,
        out_shape=jax.ShapeDtypeStruct((B_pad, out_pad), jnp.float32),
        grid_spec=pltpu.PrefetchScalarGridSpec(
            num_scalar_prefetch=0,
            grid=grid,
            in_specs=in_specs,
            out_specs=o_spec,
        ),
        compiler_params=pltpu.CompilerParams(
            dimension_semantics=("parallel", "arbitrary"),
            vmem_limit_bytes=vmem_limit,
        ),
        cost_estimate=cost,
    )(*inputs)

    return y_pad[:B, :prepared["out_dim"]]


# ---------------------------------------------------------------------------
# Init mirroring NoisyLinear.reset_parameters / reset_epsilon
# ---------------------------------------------------------------------------

def init_noisy_linear_params(key, input_dim, output_dim):
    """This module draws a full i.i.d. normal epsilon matrix (not factored noise)."""
    k_wmu, k_bmu, k_weps, k_beps = jax.random.split(key, 4)
    mu_range = 1.0 / math.sqrt(input_dim)
    sigma_init = 0.017
    return {
        "weight_mu": jax.random.uniform(
            k_wmu, (output_dim, input_dim), jnp.float32, -mu_range, mu_range),
        "weight_sigma": jnp.full((output_dim, input_dim), sigma_init, jnp.float32),
        "bias_mu": jax.random.uniform(
            k_bmu, (output_dim,), jnp.float32, -mu_range, mu_range),
        "bias_sigma": jnp.full((output_dim,), sigma_init, jnp.float32),
        "weight_epsilon": jax.random.normal(
            k_weps, (output_dim, input_dim), jnp.float32),
        "bias_epsilon": jax.random.normal(k_beps, (output_dim,), jnp.float32),
    }


if __name__ == "__main__":
    key = jax.random.PRNGKey(0)
    k_p1, k_p2, k_x1, k_x2 = jax.random.split(key, 4)

    # ---- Small layer (exercises padding of tiny dims, single-tile grid) ----
    batch, in_dim, out_dim = 8, 32, 32
    params = init_noisy_linear_params(k_p1, in_dim, out_dim)
    x = jax.random.normal(k_x1, (batch, in_dim), jnp.float32)

    prep_train = prepare_noisy_linear(params, mode="Train")   # prepared once, reused
    prep_eval = prepare_noisy_linear(params, mode="Eval")
    y_train = jax.block_until_ready(noisy_linear_forward(x, prep_train))
    y_eval = jax.block_until_ready(noisy_linear_forward(x, prep_eval))

    w_eff = params["weight_mu"] + params["weight_sigma"] * params["weight_epsilon"]
    b_eff = params["bias_mu"] + params["bias_sigma"] * params["bias_epsilon"]
    ref_train = x @ w_eff.T + b_eff
    ref_eval = x @ params["weight_mu"].T + params["bias_mu"]
    assert y_train.shape == (batch, out_dim)
    assert jnp.allclose(y_train, ref_train, atol=1e-5, rtol=1e-5)
    assert jnp.allclose(y_eval, ref_eval, atol=1e-5, rtol=1e-5)

    # ---- DQN-sized, non-power-of-two layer: multi-tile N axis (megacore),
    #      whole-dim K block, plus the bf16 weight-stream path ----
    batch2, in_dim2, out_dim2 = 8, 640, 512
    params2 = init_noisy_linear_params(k_p2, in_dim2, out_dim2)
    x2 = jax.random.normal(k_x2, (batch2, in_dim2), jnp.float32)

    prep2 = prepare_noisy_linear(params2, mode="Train")
    prep2_bf16 = prepare_noisy_linear(params2, mode="Train",
                                      compute_dtype=jnp.bfloat16)
    y2 = jax.block_until_ready(noisy_linear_forward(x2, prep2))
    y2_bf16 = jax.block_until_ready(noisy_linear_forward(x2, prep2_bf16))

    w_eff2 = params2["weight_mu"] + params2["weight_sigma"] * params2["weight_epsilon"]
    b_eff2 = params2["bias_mu"] + params2["bias_sigma"] * params2["bias_epsilon"]
    ref2 = x2 @ w_eff2.T + b_eff2
    assert jnp.allclose(y2, ref2, atol=1e-4, rtol=1e-4)
    assert jnp.allclose(y2_bf16, ref2, atol=0.2, rtol=5e-2)

    print("KERNEL_OK")
</pallas_src>

<mosaic_0001>
module attributes {stable_mosaic.version = 11 : i64} {
  func.func @kernel(%arg0: i32, %arg1: i32, %arg2: memref<8x128xf32, #tpu.memory_space<vmem>>, %arg3: memref<128x128xf32, #tpu.memory_space<vmem>>, %arg4: memref<128x128xf32, #tpu.memory_space<vmem>>, %arg5: memref<128x128xf32, #tpu.memory_space<vmem>>, %arg6: memref<1x128xf32, #tpu.memory_space<vmem>>, %arg7: memref<8x128xf32, #tpu.memory_space<vmem>>) attributes {dimension_semantics = [#tpu.dimension_semantics<parallel>, #tpu.dimension_semantics<arbitrary>], iteration_bounds = array<i64: 1, 1>, scalar_prefetch = 0 : i64, scratch_operands = 0 : i64, tpu.core_type = #tpu.core_type<tc>, window_params = [{pipeline_mode = #tpu.pipeline_mode<synchronous>, transform_indices = @transform_0, window_bounds = array<i64: 8, 128>}, {transform_indices = @transform_1, window_bounds = array<i64: 128, 128>}, {transform_indices = @transform_2, window_bounds = array<i64: 128, 128>}, {transform_indices = @transform_3, window_bounds = array<i64: 128, 128>}, {transform_indices = @transform_4, window_bounds = array<i64: 1, 128>}, {transform_indices = @transform_5, window_bounds = array<i64: 8, 128>}]} {
    %c0_i32 = arith.constant 0 : i32
    %0 = arith.cmpi eq, %arg1, %c0_i32 : i32
    %1 = arith.extui %0 : i1 to i32
    %c0_i32_0 = arith.constant 0 : i32
    %2 = arith.cmpi ne, %1, %c0_i32_0 : i32
    scf.if %2 {
      %cst_13 = arith.constant 0.000000e+00 : f32
      %19 = vector.broadcast %cst_13 : f32 to vector<8x128xf32>
      %c0_14 = arith.constant 0 : index
      %c0_15 = arith.constant 0 : index
      %20 = vector.load %arg7[%c0_14, %c0_15] : memref<8x128xf32, #tpu.memory_space<vmem>>, vector<8x128xf32>
      tpu.vector_store %arg7[%c0_14, %c0_15], %19 {strides = array<i32>} : memref<8x128xf32, #tpu.memory_space<vmem>>, vector<8x128xf32>,
    } else {
    }
    %c128_i32 = arith.constant 128 : i32
    %3 = arith.muli %arg1, %c128_i32 : i32
    %4 = tpu.assume_multiple %3, 128 : i32
    %c0 = arith.constant 0 : index
    %5 = arith.index_cast %4 : i32 to index
    %6 = vector.load %arg2[%c0, %5] : memref<8x128xf32, #tpu.memory_space<vmem>>, vector<8x128xf32>
    %c0_1 = arith.constant 0 : index
    %c0_2 = arith.constant 0 : index
    %7 = vector.load %arg3[%c0_1, %c0_2] : memref<128x128xf32, #tpu.memory_space<vmem>>, vector<128x128xf32>
    %c0_3 = arith.constant 0 : index
    %c0_4 = arith.constant 0 : index
    %8 = vector.load %arg4[%c0_3, %c0_4] : memref<128x128xf32, #tpu.memory_space<vmem>>, vector<128x128xf32>
    %c0_5 = arith.constant 0 : index
    %c0_6 = arith.constant 0 : index
    %9 = vector.load %arg5[%c0_5, %c0_6] : memref<128x128xf32, #tpu.memory_space<vmem>>, vector<128x128xf32>
    %10 = arith.mulf %8, %9 : vector<128x128xf32>
    %11 = arith.addf %7, %10 : vector<128x128xf32>
    %c0_7 = arith.constant 0 : index
    %c0_8 = arith.constant 0 : index
    %12 = vector.load %arg7[%c0_7, %c0_8] : memref<8x128xf32, #tpu.memory_space<vmem>>, vector<8x128xf32>
    %cst = arith.constant dense<0.000000e+00> : vector<8x128xf32>
    %13 = tpu.matmul %6, %11, %cst {dimension_numbers = #tpu.dot_dimension_numbers<[1], [0], [0], [1], [0, 0, 1, 1], [], []>} : vector<8x128xf32>, vector<128x128xf32>, vector<8x128xf32> -> vector<8x128xf32>
    %14 = arith.addf %12, %13 : vector<8x128xf32>
    %c0_9 = arith.constant 0 : index
    %c0_10 = arith.constant 0 : index
    %15 = vector.load %arg7[%c0_9, %c0_10] : memref<8x128xf32, #tpu.memory_space<vmem>>, vector<8x128xf32>
    tpu.vector_store %arg7[%c0_9, %c0_10], %14 {strides = array<i32>} : memref<8x128xf32, #tpu.memory_space<vmem>>, vector<8x128xf32>,
    %c0_i32_11 = arith.constant 0 : i32
    %16 = arith.cmpi eq, %arg1, %c0_i32_11 : i32
    %17 = arith.extui %16 : i1 to i32
    %c0_i32_12 = arith.constant 0 : i32
    %18 = arith.cmpi ne, %17, %c0_i32_12 : i32
    scf.if %18 {
      %c0_13 = arith.constant 0 : index
      %c0_14 = arith.constant 0 : index
      %19 = vector.load %arg7[%c0_13, %c0_14] : memref<8x128xf32, #tpu.memory_space<vmem>>, vector<8x128xf32>
      %c0_15 = arith.constant 0 : index
      %c0_16 = arith.constant 0 : index
      %20 = vector.load %arg6[%c0_15, %c0_16] : memref<1x128xf32, #tpu.memory_space<vmem>>, vector<1x128xf32>
      %21 = vector.broadcast %20 : vector<1x128xf32> to vector<8x128xf32>
      %22 = arith.addf %19, %21 : vector<8x128xf32>
      %c0_17 = arith.constant 0 : index
      %c0_18 = arith.constant 0 : index
      %23 = vector.load %arg7[%c0_17, %c0_18] : memref<8x128xf32, #tpu.memory_space<vmem>>, vector<8x128xf32>
      tpu.vector_store %arg7[%c0_17, %c0_18], %22 {strides = array<i32>} : memref<8x128xf32, #tpu.memory_space<vmem>>, vector<8x128xf32>,
    } else {
    }
    return
  }
  func.func @transform_0(%arg0: i32, %arg1: i32) -> (i32, i32) {
    %c0_i32 = arith.constant 0 : i32
    %c0_i32_0 = arith.constant 0 : i32
    %c0_i32_1 = arith.constant 0 : i32
    return %c0_i32, %c0_i32_0 : i32, i32
  }
  func.func @transform_1(%arg0: i32, %arg1: i32) -> (i32, i32) {
    %c0_i32 = arith.constant 0 : i32
    return %arg1, %arg0 : i32, i32
  }
  func.func @transform_2(%arg0: i32, %arg1: i32) -> (i32, i32) {
    %c0_i32 = arith.constant 0 : i32
    return %arg1, %arg0 : i32, i32
  }
  func.func @transform_3(%arg0: i32, %arg1: i32) -> (i32, i32) {
    %c0_i32 = arith.constant 0 : i32
    return %arg1, %arg0 : i32, i32
  }
  func.func @transform_4(%arg0: i32, %arg1: i32) -> (i32, i32) {
    %c0_i32 = arith.constant 0 : i32
    %c0_i32_0 = arith.constant 0 : i32
    return %c0_i32, %arg0 : i32, i32
  }
  func.func @transform_5(%arg0: i32, %arg1: i32) -> (i32, i32) {
    %c0_i32 = arith.constant 0 : i32
    %c0_i32_0 = arith.constant 0 : i32
    return %c0_i32, %arg0 : i32, i32
  }
}

</mosaic_0001>

<bundles_post_ra>
// kernel: tpu_custom_call.1
= control target key start
LH: loop header
LB: loop body
LE: loop exit
PB: predicated region body
PF: predicated region fallthrough
CT: control target
= control target key end

     0   :  { %10 = vsyncpa [#allocation3], 0  ;;  %s593_s0 = inlined_call_operand.hbm [shape: f32[8,128], index: 0, kind: input, shape index: {}]   ;;  %s594_s1 = inlined_call_operand.hbm [shape: f32[128,128], index: 1, kind: input, shape index: {}]   ;;  %s595_s2 = inlined_call_operand.hbm [shape: f32[128,128], index: 2, kind: input, shape index: {}]   ;;  %s596_s3 = inlined_call_operand.hbm [shape: f32[128,128], index: 3, kind: input, shape index: {}]   ;;  %s597_s4 = inlined_call_operand.vmem [shape: f32[1,128], index: 4, kind: input, shape index: {}]   ;;  %s598_s5 = inlined_call_operand.hbm [shape: f32[8,128], index: 5, kind: output, shape index: {}]  }
   0x1   :  { %11 = vsyncpa [#allocation6], 0 }
   0x2   :  { %12 = vsyncpa [#allocation9], 0 }
   0x3   :  { %13 = vsyncpa [#allocation4], 0  ;;  %s473_s18 = smov [#allocation5]   ;;  %s355_s22 = scalar_lea.hbm %s594_s1, 2048 }
   0x4   :  { %s29_s19 = sshll.u32 %s473_s18, 4  ;;  %p356_p0 = scmp.ne.s32.totalorder %s594_s1, %s355_s22  ;;  %s30_s19 = int_to_ptr.vmem [resolvable:$true] %s29_s19 }
   0x5   :  { %p359_p1 = scmp.lt.u32.totalorder %s355_s22, %s594_s1 }
   0x7   :  { %p361_p2 = pnand %p359_p1, %p356_p0 }
   0x9   :  { %364 = shalt.err (!%p361_p2)
}
   0xa   :  { %s365_s27 = scalar_lea.vmem %s30_s19, 2048  ;;  %p370_p4 = scmp.lt.s32.totalorder %s30_s19, %s30_s19 }
   0xb   :  { %p366_p3 = scmp.ne.s32.totalorder %s30_s19, %s365_s27  ;;  %p371_p5 = scmp.lt.s32.totalorder %s365_s27, %s365_s27 }
   0xd   :  { %p372_p6 = por %p371_p5, %p370_p4 }
   0xf   :  { %p373_p7 = pnand %p372_p6, %p366_p3 }
  0x11   :  { %376 = shalt.err (!%p373_p7)
}
  0x12   :  { %s474_s28 = smov 128   ;;  %s475_s29 = smov 8  }
  0x13   :  { %35 = dma.hbm_to_vmem [thread:$0]  %s594_s1, 2048, %s30_s19, [#allocation6], %s474_s28, %s474_s28, %s475_s29  }
  0x14   :  { %s476_s7 = smov [#allocation2]   ;;  %s477_s9 = smov [#allocation7]  }
  0x15   :  { %s20_s8 = sshll.u32 %s476_s7, 4  ;;  %s41_s10 = sshll.u32 %s477_s9, 4  ;;  %s21_s8 = int_to_ptr.vmem [resolvable:$true] %s20_s8  ;;  %s42_s10 = int_to_ptr.vmem [resolvable:$true] %s41_s10 }
  0x16   :  { %s377_s13 = scalar_lea.hbm %s593_s0, 128 }
  0x17   :  { %p378_p8 = scmp.ne.s32.totalorder %s593_s0, %s377_s13  ;;  %p381_p9 = scmp.lt.u32.totalorder %s377_s13, %s593_s0 }
  0x19   :  { %p383_p10 = pnand %p381_p9, %p378_p8 }
  0x1b   :  { %386 = shalt.err (!%p383_p10)
}
  0x1c   :  { %s387_s1 = scalar_lea.vmem %s21_s8, 128  ;;  %p392_p12 = scmp.lt.s32.totalorder %s21_s8, %s21_s8 }
  0x1d   :  { %p388_p11 = scmp.ne.s32.totalorder %s21_s8, %s387_s1  ;;  %p393_p13 = scmp.lt.s32.totalorder %s387_s1, %s387_s1 }
  0x1f   :  { %p394_p0 = por %p393_p13, %p392_p12 }
  0x21   :  { %p395_p1 = pnand %p394_p0, %p388_p11 }
  0x23   :  { %398 = shalt.err (!%p395_p1)
}
  0x24   :  { %23 = dma.hbm_to_vmem [thread:$0]  %s593_s0, 128, %s21_s8, [#allocation3]  }
  0x25   :  { %s399_s22 = scalar_lea.hbm %s595_s2, 2048 }
  0x26   :  { %p400_p2 = scmp.ne.s32.totalorder %s595_s2, %s399_s22  ;;  %p403_p3 = scmp.lt.u32.totalorder %s399_s22, %s595_s2 }
  0x28   :  { %p405_p4 = pnand %p403_p3, %p400_p2 }
  0x2a   :  { %408 = shalt.err (!%p405_p4)
}
  0x2b   :  { %s409_s27 = scalar_lea.vmem %s42_s10, 2048  ;;  %p414_p6 = scmp.lt.s32.totalorder %s42_s10, %s42_s10 }
  0x2c   :  { %p410_p5 = scmp.ne.s32.totalorder %s42_s10, %s409_s27  ;;  %p415_p7 = scmp.lt.s32.totalorder %s409_s27, %s409_s27 }
  0x2e   :  { %p416_p8 = por %p415_p7, %p414_p6 }
  0x30   :  { %p417_p9 = pnand %p416_p8, %p410_p5 }
  0x32   :  { %420 = shalt.err (!%p417_p9)
}
  0x33   :  { %47 = dma.hbm_to_vmem [thread:$0]  %s595_s2, 2048, %s42_s10, [#allocation6], %s474_s28, %s474_s28, %s475_s29  }
  0x34   :  { %s478_s6 = smov [#allocation8]   ;;  %s421_s11 = scalar_lea.hbm %s596_s3, 2048 }
  0x35   :  { %s53_s7 = sshll.u32 %s478_s6, 4  ;;  %p422_p10 = scmp.ne.s32.totalorder %s596_s3, %s421_s11  ;;  %s54_s7 = int_to_ptr.vmem [resolvable:$true] %s53_s7 }
  0x36   :  { %p425_p11 = scmp.lt.u32.totalorder %s421_s11, %s596_s3 }
  0x38   :  { %p427_p12 = pnand %p425_p11, %p422_p10 }
  0x3a   :  { %430 = shalt.err (!%p427_p12)
}
  0x3b   :  { %s431_s16 = scalar_lea.vmem %s54_s7, 2048  ;;  %p436_p0 = scmp.lt.s32.totalorder %s54_s7, %s54_s7 }
  0x3c   :  { %p432_p13 = scmp.ne.s32.totalorder %s54_s7, %s431_s16  ;;  %p437_p1 = scmp.lt.s32.totalorder %s431_s16, %s431_s16 }
  0x3e   :  { %p438_p2 = por %p437_p1, %p436_p0 }
  0x40   :  { %p439_p3 = pnand %p438_p2, %p432_p13 }
  0x42   :  { %442 = shalt.err (!%p439_p3)
}
  0x43   :  { %59 = dma.hbm_to_vmem [thread:$0]  %s596_s3, 2048, %s54_s7, [#allocation9], %s474_s28, %s474_s28, %s475_s29  }
  0x44   :  { %465 = dma.done.wait [#allocation3], 128  }
  0x45   :  { %466 = vsyncadd [#allocation3], 4294967168 }
  0x46   :  { %467 = dma.done.wait [#allocation6], 4096  }
  0x47   :  { %468 = vsyncadd [#allocation6], 4294963200 }
  0x48   :  { %469 = dma.done.wait [#allocation9], 2048  }
  0x49   :  { %470 = vsyncadd [#allocation9], 4294965248  ;;  %v479_v0 = vmov 0.0|0.0   ;;  %vm480_vm0 = vmmov 0   ;;  %v481_v1 = vmov 0.0   ;;  %v84_v2 = vld [vmem:[#allocation5] sm:$0xff] }
  0x4a   :  { %321 = vmatprep.subr.bf16.mxu0 %v479_v0  ;;  %318 = vmatprep.mubr.msk.f32.mxu0 %vm480_vm0, %v481_v1  ;;  %v85_v3 = vld [vmem:[#allocation5 + $0x8] sm:$0xff]  ;;  %v100_v4 = vld [vmem:[#allocation7] sm:$0xff]  ;;  %v86_v10 = vld [vmem:[#allocation5 + $0x10] sm:$0xff]  ;;  %s482_s29 = smov [#allocation10]  }
  0x4b   :  { %v101_v5 = vld [vmem:[#allocation7 + $0x8] sm:$0xff]  ;;  %v116_v6 = vld [vmem:[#allocation8] sm:$0xff]  ;;  %v87_v11 = vld [vmem:[#allocation5 + $0x18] sm:$0xff]  ;;  %s256_s17 = sshll.u32 %s482_s29, 4  ;;  %s257_s17 = int_to_ptr.vmem [resolvable:$true] %s256_s17 }
  0x4c   :  { %v117_v7 = vld [vmem:[#allocation8 + $0x8] sm:$0xff]  ;;  %v132_v8 = vmul.f32 %v116_v6, %v100_v4  ;;  %v102_v12 = vld [vmem:[#allocation7 + $0x10] sm:$0xff]  ;;  %v103_v13 = vld [vmem:[#allocation7 + $0x18] sm:$0xff]  ;;  %s443_s1 = scalar_lea.vmem %s257_s17, 128  ;;  %p448_p5 = scmp.lt.s32.totalorder %s257_s17, %s257_s17 }
  0x4d   :  { %v133_v9 = vmul.f32 %v117_v7, %v101_v5  ;;  %v118_v14 = vld [vmem:[#allocation8 + $0x10] sm:$0xff]  ;;  %v119_v15 = vld [vmem:[#allocation8 + $0x18] sm:$0xff]  ;;  %v88_v20 = vld [vmem:[#allocation5 + $0x20] sm:$0xff]  ;;  %p444_p4 = scmp.ne.s32.totalorder %s257_s17, %s443_s1  ;;  %p449_p6 = scmp.lt.s32.totalorder %s443_s1, %s443_s1 }
  0x4e   :  { %v148_v16 = vadd.f32 %v132_v8, %v84_v2  ;;  %v134_v18 = vmul.f32 %v118_v14, %v102_v12  ;;  %v135_v19 = vmul.f32 %v119_v15, %v103_v13  ;;  %v104_v21 = vld [vmem:[#allocation7 + $0x20] sm:$0xff]  ;;  %v105_v22 = vld [vmem:[#allocation7 + $0x28] sm:$0xff]  ;;  %v106_v30 = vld [vmem:[#allocation7 + $0x30] sm:$0xff] }
  0x4f   :  { %v149_v17 = vadd.f32 %v133_v9, %v85_v3  ;;  %v120_v23 = vld [vmem:[#allocation8 + $0x20] sm:$0xff]  ;;  %v121_v24 = vld [vmem:[#allocation8 + $0x28] sm:$0xff]  ;;  %v107_v32 = vld [vmem:[#allocation7 + $0x38] sm:$0xff]  ;;  %p450_p7 = por %p449_p6, %p448_p5 }
  0x50   :  { %v150_v26 = vadd.f32 %v134_v18, %v86_v10  ;;  %v151_v27 = vadd.f32 %v135_v19, %v87_v11  ;;  %v89_v28 = vld [vmem:[#allocation5 + $0x28] sm:$0xff]  ;;  %v136_v29 = vmul.f32 %v120_v23, %v104_v21  ;;  %v137_v31 = vmul.f32 %v121_v24, %v105_v22  ;;  %v122_v33 = vld [vmem:[#allocation8 + $0x30] sm:$0xff]  ;;  %v123_v34 = vld [vmem:[#allocation8 + $0x38] sm:$0xff] }
  0x51   :  { %v322_v25 = vpack.c.bf16 %v149_v17, %v148_v16  ;;  %v90_v37 = vld [vmem:[#allocation5 + $0x30] sm:$0xff]  ;;  %v91_v38 = vld [vmem:[#allocation5 + $0x38] sm:$0xff]  ;;  %v138_v39 = vmul.f32 %v122_v33, %v106_v30  ;;  %v139_v40 = vmul.f32 %v123_v34, %v107_v32  ;;  %v108_v41 = vld [vmem:[#allocation7 + $0x40] sm:$0xff]  ;;  %p451_p8 = pnand %p450_p7, %p444_p4 }
  0x52   :  { %v325_v35 = vpack.c.bf16 %v151_v27, %v150_v26  ;;  %v152_v36 = vadd.f32 %v136_v29, %v88_v20  ;;  %v153_v42 = vadd.f32 %v137_v31, %v89_v28  ;;  %v109_v43 = vld [vmem:[#allocation7 + $0x48] sm:$0xff]  ;;  %v124_v44 = vld [vmem:[#allocation8 + $0x40] sm:$0xff]  ;;  %v110_v53 = vld [vmem:[#allocation7 + $0x50] sm:$0xff] }
  0x53   :  { %323 = vmatpush3.bf16.msra.mxu0 %v322_v25  ;;  %v125_v45 = vld [vmem:[#allocation8 + $0x48] sm:$0xff]  ;;  %v154_v46 = vadd.f32 %v138_v39, %v90_v37  ;;  %v155_v47 = vadd.f32 %v139_v40, %v91_v38  ;;  %v92_v49 = vld [vmem:[#allocation5 + $0x40] sm:$0xff]  ;;  %v140_v51 = vmul.f32 %v124_v44, %v108_v41  ;;  %v111_v54 = vld [vmem:[#allocation7 + $0x58] sm:$0xff] }
  0x54   :  { %324 = vmatprep.subr.bf16.mxu0 %v479_v0  ;;  %v328_v48 = vpack.c.bf16 %v153_v42, %v152_v36  ;;  %v93_v50 = vld [vmem:[#allocation5 + $0x48] sm:$0xff]  ;;  %v141_v52 = vmul.f32 %v125_v45, %v109_v43  ;;  %v126_v55 = vld [vmem:[#allocation8 + $0x50] sm:$0xff]  ;;  %v127_v56 = vld [vmem:[#allocation8 + $0x58] sm:$0xff] }
  0x55   :  { %v331_v57 = vpack.c.bf16 %v155_v47, %v154_v46  ;;  %v156_v58 = vadd.f32 %v140_v51, %v92_v49  ;;  %v94_v60 = vld [vmem:[#allocation5 + $0x50] sm:$0xff]  ;;  %v142_v61 = vmul.f32 %v126_v55, %v110_v53  ;;  %v143_v62 = vmul.f32 %v127_v56, %v111_v54  ;;  %v112_v63 = vld [vmem:[#allocation7 + $0x60] sm:$0xff]  ;;  %v95_v2 = vld [vmem:[#allocation5 + $0x58] sm:$0xff] }
  0x56   :  { %v157_v59 = vadd.f32 %v141_v52, %v93_v50  ;;  %v128_v1 = vld [vmem:[#allocation8 + $0x60] sm:$0xff]  ;;  %v113_v3 = vld [vmem:[#allocation7 + $0x68] sm:$0xff]  ;;  %v114_v12 = vld [vmem:[#allocation7 + $0x70] sm:$0xff] }
  0x57   :  { %326 = vmatpush3.bf16.msra.mxu0 %v325_v35  ;;  %v129_v4 = vld [vmem:[#allocation8 + $0x68] sm:$0xff]  ;;  %v144_v5 = vmul.f32 %v128_v1, %v112_v63  ;;  %v158_v7 = vadd.f32 %v142_v61, %v94_v60  ;;  %v159_v8 = vadd.f32 %v143_v62, %v95_v2  ;;  %v96_v9 = vld [vmem:[#allocation5 + $0x60] sm:$0xff]  ;;  %v115_v13 = vld [vmem:[#allocation7 + $0x78] sm:$0xff] }
  0x58   :  { %327 = vmatprep.subr.bf16.mxu0 %v479_v0  ;;  %v334_v6 = vpack.c.bf16 %v157_v59, %v156_v58  ;;  %v97_v10 = vld [vmem:[#allocation5 + $0x68] sm:$0xff]  ;;  %v145_v11 = vmul.f32 %v129_v4, %v113_v3  ;;  %v130_v14 = vld [vmem:[#allocation8 + $0x70] sm:$0xff]  ;;  %v131_v15 = vld [vmem:[#allocation8 + $0x78] sm:$0xff] }
  0x59   :  { %v160_v16 = vadd.f32 %v144_v5, %v96_v9  ;;  %v337_v17 = vpack.c.bf16 %v159_v8, %v158_v7  ;;  %v146_v19 = vmul.f32 %v130_v14, %v114_v12  ;;  %v147_v20 = vmul.f32 %v131_v15, %v115_v13  ;;  %v98_v21 = vld [vmem:[#allocation5 + $0x70] sm:$0xff]  ;;  %v99_v22 = vld [vmem:[#allocation5 + $0x78] sm:$0xff] }
  0x5a   :  { %v161_v18 = vadd.f32 %v145_v11, %v97_v10  ;;  %v83_v27 = vld [vmem:[#allocation2] sm:$0xff] }
  0x5b   :  { %329 = vmatpush3.bf16.msra.mxu0 %v328_v48  ;;  %v162_v24 = vadd.f32 %v146_v19, %v98_v21  ;;  %v163_v25 = vadd.f32 %v147_v20, %v99_v22  ;;  %v268_v29 = vld [vmem:[%s597_s4] ss:$0 sm:$0xff] }
  0x5c   :  { %330 = vmatprep.subr.bf16.mxu0 %v479_v0  ;;  %v340_v23 = vpack.c.bf16 %v161_v18, %v160_v16 }
  0x5d   :  { %v343_v26 = vpack.c.bf16 %v163_v25, %v162_v24 }
  0x5f   :  { %332 = vmatpush3.bf16.msra.mxu0 %v331_v57 }
  0x60   :  { %333 = vmatprep.subr.bf16.mxu0 %v479_v0 }
  0x63   :  { %335 = vmatpush3.bf16.msra.mxu0 %v334_v6 }
  0x64   :  { %336 = vmatprep.subr.bf16.mxu0 %v479_v0 }
  0x67   :  { %338 = vmatpush3.bf16.msra.mxu0 %v337_v17 }
  0x68   :  { %339 = vmatprep.subr.bf16.mxu0 %v479_v0 }
  0x6b   :  { %341 = vmatpush3.bf16.msra.mxu0 %v340_v23 }
  0x6c   :  { %342 = vmatprep.subr.bf16.mxu0 %v479_v0 }
  0x6f   :  { %344 = vmatpush3.bf16.msra.mxu0 %v343_v26 }
  0x72   :  { %319 = vmatmul.mubr.f32.vlgmr.msra.gmra.mrb[0].mxu0 %v83_v27 }
 0x145   :  { %v231_v28 = vpop.f32.mrb[0].mxu0 }
 0x146   :  { %v320_v30 = vpop.f32.mrb[1].mxu0  ;;  %v248_v31 = vadd.f32 %v268_v29, %v231_v28 }
 0x148   :  { %249 = vst [vmem:[#allocation10] sm:$0xff] %v248_v31 }
 0x149   :  { %454 = shalt.err (!%p451_p8)
}
 0x14a   :  { %s455_s20 = scalar_lea.hbm %s598_s5, 128 }
 0x14b   :  { %p456_p9 = scmp.ne.s32.totalorder %s598_s5, %s455_s20  ;;  %p459_p10 = scmp.lt.u32.totalorder %s455_s20, %s598_s5 }
 0x14d   :  { %p461_p11 = pnand %p459_p10, %p456_p9 }
 0x14f   :  { %464 = shalt.err (!%p461_p11)
}
 0x150   :  { %259 = dma.vmem_to_hbm [thread:$0]  %s257_s17, 128, %s598_s5, [#allocation4]  }
 0x151   :  { %471 = dma.done.wait [#allocation4], 128  }
 0x152   :  { %472 = vsyncadd [#allocation4], 4294967168 }
 0x153   :  { %263 = vsyncpa [#allocation3], 1 }
 0x154   :  { %264 = vsyncpa [#allocation6], 1 }
 0x155   :  { %265 = vsyncpa [#allocation9], 1 }
 0x156   :  { %266 = vsyncpa [#allocation4], 1 }

</bundles_post_ra>
